<compile_context>
chip_gen: v6e
topology: v6e:2x2x1
jax: 0.10.0
libtpu: 0.0.40
codegen_flags: <defaults>
</compile_context>

<pallas_src>
import functools

import jax
import jax.numpy as jnp
from jax.experimental import pallas as pl
from jax.experimental.pallas import tpu as pltpu


def _round_up(x, m):
    return ((x + m - 1) // m) * m


def _vmem_capacity_bytes():
    try:
        return int(pltpu.get_tpu_info().vmem_capacity_bytes)
    except Exception:
        return 64 * 1024 * 1024  # conservative: v7x per-TC VMEM


def _pick_row_tile(m, tm_max):
    """Pick (tm, M_pad): tm multiple of 8, kept >=128 when tiling, minimal pad rows."""
    m8 = _round_up(m, 8)
    if m8 <= tm_max:
        return m8, m8  # single M tile, no padding beyond 8-row round-up
    best_tm, best_pad = None, None
    for tm in range(tm_max, 127, -8):  # keep tm >= 128 so the MXU M dim stays full
        pad = _round_up(m8, tm) - m8
        if best_pad is None or pad < best_pad:
            best_tm, best_pad = tm, pad
            if pad == 0:
                break
    return best_tm, _round_up(m8, best_tm)


def _pick_lane_tile(n, t_max):
    """Pick (t, N_pad): t multiple of 128, minimal pad cols (no exact-divisor trap)."""
    n128 = _round_up(n, 128)
    if n128 <= t_max:
        return n128, n128
    best_t, best_pad = None, None
    for t in range(min(t_max, n128), 127, -128):
        pad = _round_up(n128, t) - n128
        if best_pad is None or pad < best_pad:
            best_t, best_pad = t, pad
            if pad == 0:
                break
    return best_t, _round_up(n128, best_t)


def _fh_kernel_kloop(x_ref, w_ref, b_ref, o_ref, acc_ref):
    # x_ref: (tm, tk), w_ref: (tk, tn), b_ref: (1, tn), o_ref: (tm, tn)
    k = pl.program_id(2)

    @pl.when(k == 0)
    def _init():
        acc_ref[...] = jnp.zeros_like(acc_ref)

    acc_ref[...] += jnp.dot(x_ref[...], w_ref[...],
                            preferred_element_type=jnp.float32)

    @pl.when(k == pl.num_programs(2) - 1)
    def _finalize():
        o_ref[...] = (acc_ref[...] + b_ref[...]).astype(o_ref.dtype)
    # TODO(synk): dropout is identity here (head_dropout=0 / eval mode); for p>0
    # training-mode dropout, use pltpu.prng_seed + pltpu.prng_random_bits to mask.


def _fh_kernel_single(x_ref, w_ref, b_ref, o_ref):
    # Whole reduction fits in one K tile: no accumulator scratch, no init pass.
    o_ref[...] = (jnp.dot(x_ref[...], w_ref[...],
                          preferred_element_type=jnp.float32)
                  + b_ref[...]).astype(o_ref.dtype)


@functools.partial(jax.jit, static_argnames=("tm_max", "tn_max", "tk_max"))
def flatten_head(x, weight, bias, *, tm_max=512, tn_max=256, tk_max=2048):
    """x: (bs, n_vars, d_model, patch_num); weight: (nf, pred_len); bias: (pred_len,)."""
    bs, n_vars, d_model, patch_num = x.shape
    nf = d_model * patch_num
    pred_len = weight.shape[1]
    assert weight.shape[0] == nf

    M = bs * n_vars
    x2d = x.reshape(M, nf)

    # ---- hardware-aware static tile selection (shapes static under jit) ----
    vmem_cap = _vmem_capacity_bytes()
    # 128-MiB-VMEM parts (v5e/v6e): allow deeper K tiles (fewer, longer DMAs).
    tk_cap = max(tk_max, 4096) if vmem_cap >= 100 * 1024 * 1024 else tk_max

    tm, M_pad = _pick_row_tile(M, tm_max)
    tk, K_pad = _pick_lane_tile(nf, tk_cap)
    tn, P_pad = _pick_lane_tile(pred_len, tn_max)

    # v7x megacore: guarantee >= 2 tiles on a "parallel" axis when possible so
    # both TensorCores get work (harmless on single-TC v5e/v6e).
    if (M_pad // tm) * (P_pad // tn) == 1:
        if P_pad >= 256:
            tn = (P_pad // 2) if (P_pad // 128) % 2 == 0 else 128
        elif M_pad >= 256:
            tm = _round_up(M_pad // 2, 8)
            M_pad = 2 * tm

    n_i, n_j, n_k = M_pad // tm, P_pad // tn, K_pad // tk
    single_k = (n_k == 1)

    # ---- zero-pad operands (skipped entirely when already aligned) ----
    xp = x2d if (M_pad == M and K_pad == nf) else jnp.pad(
        x2d, ((0, M_pad - M), (0, K_pad - nf)))
    wp = weight if (K_pad == nf and P_pad == pred_len) else jnp.pad(
        weight, ((0, K_pad - nf), (0, P_pad - pred_len)))
    b2 = bias.reshape(1, pred_len)
    bp = b2 if P_pad == pred_len else jnp.pad(b2, ((0, 0), (0, P_pad - pred_len)))

    itemsize = jnp.dtype(x.dtype).itemsize
    # double-buffered x/w/b/out tiles (+ f32 accumulator if K is tiled), 2x headroom,
    # clamped to 75% of per-core VMEM (v7x: ~48 MiB, v5e/v6e: ~96 MiB).
    vmem_est = 2 * (tm * tk + tk * tn + tn + tm * tn) * itemsize
    if not single_k:
        vmem_est += tm * tn * 4
    vmem_limit = int(min(max(2 * vmem_est, 32 * 1024 * 1024),
                         (vmem_cap * 3) // 4))

    cost = pl.CostEstimate(
        flops=2 * M_pad * K_pad * P_pad,
        transcendentals=0,
        bytes_accessed=itemsize * (n_j * M_pad * K_pad      # x re-read per N tile
                                   + n_i * K_pad * P_pad    # w re-read per M tile
                                   + P_pad
                                   + M_pad * P_pad),
    )

    if single_k:
        grid_spec = pltpu.PrefetchScalarGridSpec(
            num_scalar_prefetch=0,
            grid=(n_i, n_j),
            in_specs=[
                pl.BlockSpec((tm, tk), lambda i, j: (i, 0)),
                pl.BlockSpec((tk, tn), lambda i, j: (0, j)),
                pl.BlockSpec((1, tn), lambda i, j: (0, j)),
            ],
            out_specs=pl.BlockSpec((tm, tn), lambda i, j: (i, j)),
        )
        kernel = _fh_kernel_single
        dim_sem = ("parallel", "parallel")
    else:
        grid_spec = pltpu.PrefetchScalarGridSpec(
            num_scalar_prefetch=0,
            grid=(n_i, n_j, n_k),
            in_specs=[
                pl.BlockSpec((tm, tk), lambda i, j, k: (i, k)),
                pl.BlockSpec((tk, tn), lambda i, j, k: (k, j)),
                pl.BlockSpec((1, tn), lambda i, j, k: (0, j)),
            ],
            out_specs=pl.BlockSpec((tm, tn), lambda i, j, k: (i, j)),
            scratch_shapes=[pltpu.VMEM((tm, tn), jnp.float32)],
        )
        kernel = _fh_kernel_kloop
        dim_sem = ("parallel", "parallel", "arbitrary")

    out2d = pl.pallas_call(
        kernel,
        out_shape=jax.ShapeDtypeStruct((M_pad, P_pad), x.dtype),
        grid_spec=grid_spec,
        compiler_params=pltpu.CompilerParams(
            dimension_semantics=dim_sem,
            vmem_limit_bytes=vmem_limit,
        ),
        cost_estimate=cost,
    )(xp, wp, bp)

    if M_pad != M or P_pad != pred_len:
        out2d = out2d[:M, :pred_len]
    return out2d.reshape(bs, n_vars, pred_len)


def _reference(x, weight, bias):
    bs, n_vars, d_model, patch_num = x.shape
    xf = x.reshape(bs, n_vars, d_model * patch_num)
    return jnp.einsum("bvf,fp->bvp", xf, weight) + bias


if __name__ == "__main__":
    # Small shapes consistent with FlattenHead: nf = d_model * patch_num.
    bs, n_vars, d_model, patch_num = 2, 4, 16, 8
    nf = d_model * patch_num          # 128
    pred_len = 32

    key = jax.random.PRNGKey(0)
    kx, kw, kb = jax.random.split(key, 3)

    x = jax.random.normal(kx, (bs, n_vars, d_model, patch_num), dtype=jnp.float32)

    # Deterministic nn.Linear-style init: U(-1/sqrt(nf), 1/sqrt(nf)).
    bound = 1.0 / jnp.sqrt(jnp.float32(nf))
    weight = jax.random.uniform(kw, (nf, pred_len), dtype=jnp.float32,
                                minval=-bound, maxval=bound)
    bias = jax.random.uniform(kb, (pred_len,), dtype=jnp.float32,
                              minval=-bound, maxval=bound)

    out = flatten_head(x, weight, bias)
    out = jax.block_until_ready(out)

    ref = _reference(x, weight, bias)
    assert out.shape == (bs, n_vars, pred_len)
    assert jnp.allclose(out, ref, atol=1e-5, rtol=1e-5), "mismatch vs reference"

    print("KERNEL_OK")
</pallas_src>

<mosaic_0001>
module attributes {stable_mosaic.version = 11 : i64} {
  func.func @_fh_kernel_single(%arg0: i32, %arg1: i32, %arg2: memref<8x128xf32, #tpu.memory_space<vmem>>, %arg3: memref<128x128xf32, #tpu.memory_space<vmem>>, %arg4: memref<1x128xf32, #tpu.memory_space<vmem>>, %arg5: memref<8x128xf32, #tpu.memory_space<vmem>>) attributes {dimension_semantics = [#tpu.dimension_semantics<parallel>, #tpu.dimension_semantics<parallel>], iteration_bounds = array<i64: 1, 1>, scalar_prefetch = 0 : i64, scratch_operands = 0 : i64, tpu.core_type = #tpu.core_type<tc>, window_params = [{transform_indices = @transform_0, window_bounds = array<i64: 8, 128>}, {transform_indices = @transform_1, window_bounds = array<i64: 128, 128>}, {transform_indices = @transform_2, window_bounds = array<i64: 1, 128>}, {transform_indices = @transform_3, window_bounds = array<i64: 8, 128>}]} {
    %c0 = arith.constant 0 : index
    %c0_0 = arith.constant 0 : index
    %0 = vector.load %arg2[%c0, %c0_0] : memref<8x128xf32, #tpu.memory_space<vmem>>, vector<8x128xf32>
    %c0_1 = arith.constant 0 : index
    %c0_2 = arith.constant 0 : index
    %1 = vector.load %arg3[%c0_1, %c0_2] : memref<128x128xf32, #tpu.memory_space<vmem>>, vector<128x128xf32>
    %cst = arith.constant dense<0.000000e+00> : vector<8x128xf32>
    %2 = tpu.matmul %0, %1, %cst {dimension_numbers = #tpu.dot_dimension_numbers<[1], [0], [0], [1], [0, 0, 1, 1], [], []>} : vector<8x128xf32>, vector<128x128xf32>, vector<8x128xf32> -> vector<8x128xf32>
    %c0_3 = arith.constant 0 : index
    %c0_4 = arith.constant 0 : index
    %3 = vector.load %arg4[%c0_3, %c0_4] : memref<1x128xf32, #tpu.memory_space<vmem>>, vector<1x128xf32>
    %4 = vector.broadcast %3 : vector<1x128xf32> to vector<8x128xf32>
    %5 = arith.addf %2, %4 : vector<8x128xf32>
    %c0_5 = arith.constant 0 : index
    %c0_6 = arith.constant 0 : index
    %6 = vector.load %arg5[%c0_5, %c0_6] : memref<8x128xf32, #tpu.memory_space<vmem>>, vector<8x128xf32>
    tpu.vector_store %arg5[%c0_5, %c0_6], %5 {strides = array<i32>} : memref<8x128xf32, #tpu.memory_space<vmem>>, vector<8x128xf32>,
    return
  }
  func.func @transform_0(%arg0: i32, %arg1: i32) -> (i32, i32) {
    %c0_i32 = arith.constant 0 : i32
    %c0_i32_0 = arith.constant 0 : i32
    return %arg0, %c0_i32 : i32, i32
  }
  func.func @transform_1(%arg0: i32, %arg1: i32) -> (i32, i32) {
    %c0_i32 = arith.constant 0 : i32
    %c0_i32_0 = arith.constant 0 : i32
    return %c0_i32, %arg1 : i32, i32
  }
  func.func @transform_2(%arg0: i32, %arg1: i32) -> (i32, i32) {
    %c0_i32 = arith.constant 0 : i32
    %c0_i32_0 = arith.constant 0 : i32
    return %c0_i32, %arg1 : i32, i32
  }
  func.func @transform_3(%arg0: i32, %arg1: i32) -> (i32, i32) {
    %c0_i32 = arith.constant 0 : i32
    return %arg0, %arg1 : i32, i32
  }
}

</mosaic_0001>

<bundles_post_ra>
// kernel: flatten_head.1
= control target key start
LH: loop header
LB: loop body
LE: loop exit
PB: predicated region body
PF: predicated region fallthrough
CT: control target
= control target key end

     0   :  { %v202_v1 = vmov 0.0   ;;  %vm203_vm0 = vmmov 0   ;;  %s282_s0 = inlined_call_operand.vmem [shape: f32[8,128], index: 0, kind: input, shape index: {}]   ;;  %s283_s1 = inlined_call_operand.vmem [shape: f32[128,128], index: 1, kind: input, shape index: {}]   ;;  %s284_s2 = inlined_call_operand.vmem [shape: f32[1,128], index: 2, kind: input, shape index: {}]   ;;  %s285_s3 = inlined_call_operand.hbm [shape: f32[8,128], index: 3, kind: output, shape index: {}]  }
   0x1   :  { %v31_v0 = vld [vmem:[%s283_s1 + $0x78] sm:$0xff]  ;;  %142 = vmatprep.subr.mxu0 %v202_v1  ;;  %v30_v2 = vld [vmem:[%s283_s1 + $0x70] sm:$0xff]  ;;  %174 = vmatprep.mubr.msk.f32.mxu0 %vm203_vm0, %v202_v1  ;;  %v29_v3 = vld [vmem:[%s283_s1 + $0x68] sm:$0xff] }
   0x2   :  { %143 = vmatpush3.msra.mxu0 %v31_v0  ;;  %v28_v4 = vld [vmem:[%s283_s1 + $0x60] sm:$0xff] }
   0x3   :  { %144 = vmatprep.subr.mxu0 %v202_v1 }
   0x4   :  { %145 = vmatpush3.msra.mxu0 %v30_v2 }
   0x5   :  { %146 = vmatprep.subr.mxu0 %v202_v1 }
   0x6   :  { %147 = vmatpush3.msra.mxu0 %v29_v3 }
   0x7   :  { %8 = vsyncpa [#allocation3], 0  ;;  %148 = vmatprep.subr.mxu0 %v202_v1  ;;  %v27_v5 = vld [vmem:[%s283_s1 + $0x58] sm:$0xff]  ;;  %v26_v6 = vld [vmem:[%s283_s1 + $0x50] sm:$0xff]  ;;  %s204_s21 = smov [#allocation2]  }
   0x8   :  { %149 = vmatpush3.msra.mxu0 %v28_v4  ;;  %v25_v7 = vld [vmem:[%s283_s1 + $0x48] sm:$0xff]  ;;  %v24_v8 = vld [vmem:[%s283_s1 + $0x40] sm:$0xff]  ;;  %v23_v9 = vld [vmem:[%s283_s1 + $0x38] sm:$0xff]  ;;  %s116_s22 = sshll.u32 %s204_s21, 4  ;;  %s117_s22 = int_to_ptr.vmem [resolvable:$true] %s116_s22 }
   0x9   :  { %150 = vmatprep.subr.mxu0 %v202_v1  ;;  %v22_v10 = vld [vmem:[%s283_s1 + $0x30] sm:$0xff]  ;;  %v21_v11 = vld [vmem:[%s283_s1 + $0x28] sm:$0xff]  ;;  %v20_v12 = vld [vmem:[%s283_s1 + $0x20] sm:$0xff]  ;;  %p185_p1 = scmp.lt.s32.totalorder %s117_s22, %s117_s22 }
   0xa   :  { %151 = vmatpush3.msra.mxu0 %v27_v5  ;;  %v19_v13 = vld [vmem:[%s283_s1 + $0x18] sm:$0xff]  ;;  %v18_v14 = vld [vmem:[%s283_s1 + $0x10] sm:$0xff]  ;;  %v17_v15 = vld [vmem:[%s283_s1 + $0x8] sm:$0xff] }
   0xb   :  { %152 = vmatprep.subr.mxu0 %v202_v1  ;;  %v16_v16 = vld [vmem:[%s283_s1] sm:$0xff]  ;;  %s180_s1 = scalar_lea.vmem %s117_s22, 128 }
   0xc   :  { %153 = vmatpush3.msra.mxu0 %v26_v6  ;;  %v15_v17 = vld [vmem:[%s282_s0] sm:$0xff]  ;;  %p181_p0 = scmp.ne.s32.totalorder %s117_s22, %s180_s1  ;;  %p186_p2 = scmp.lt.s32.totalorder %s180_s1, %s180_s1 }
   0xd   :  { %154 = vmatprep.subr.mxu0 %v202_v1  ;;  %v124_v18 = vld [vmem:[%s284_s2] ss:$0 sm:$0xff] }
   0xe   :  { %155 = vmatpush3.msra.mxu0 %v25_v7  ;;  %p187_p3 = por %p186_p2, %p185_p1 }
   0xf   :  { %156 = vmatprep.subr.mxu0 %v202_v1 }
  0x10   :  { %157 = vmatpush3.msra.mxu0 %v24_v8  ;;  %p188_p4 = pnand %p187_p3, %p181_p0 }
  0x11   :  { %158 = vmatprep.subr.mxu0 %v202_v1 }
  0x12   :  { %159 = vmatpush3.msra.mxu0 %v23_v9 }
  0x13   :  { %160 = vmatprep.subr.mxu0 %v202_v1 }
  0x14   :  { %161 = vmatpush3.msra.mxu0 %v22_v10 }
  0x15   :  { %162 = vmatprep.subr.mxu0 %v202_v1 }
  0x16   :  { %163 = vmatpush3.msra.mxu0 %v21_v11 }
  0x17   :  { %164 = vmatprep.subr.mxu0 %v202_v1 }
  0x18   :  { %165 = vmatpush3.msra.mxu0 %v20_v12 }
  0x19   :  { %166 = vmatprep.subr.mxu0 %v202_v1 }
  0x1a   :  { %167 = vmatpush3.msra.mxu0 %v19_v13 }
  0x1b   :  { %168 = vmatprep.subr.mxu0 %v202_v1 }
  0x1c   :  { %169 = vmatpush3.msra.mxu0 %v18_v14 }
  0x1d   :  { %170 = vmatprep.subr.mxu0 %v202_v1 }
  0x1e   :  { %171 = vmatpush3.msra.mxu0 %v17_v15 }
  0x1f   :  { %172 = vmatprep.subr.mxu0 %v202_v1 }
  0x20   :  { %173 = vmatpush3.msra.mxu0 %v16_v16 }
  0x21   :  { %175 = vmatmul.mubr.f32.vlgmr.msra.gmra.mxu0 %v15_v17 }
  0xe1   :  { %v105_v19 = vpop.f32.mrf.mxu0 }
  0xe2   :  { %v106_v20 = vadd.f32 %v124_v18, %v105_v19 }
  0xe3   :  { %v176_v21 = vpop.f32.mrf.mxu0 }
  0xe4   :  { %109 = vst [vmem:[#allocation2] sm:$0xff] %v106_v20 }
  0xe5   :  { %191 = shalt.err (!%p188_p4)
}
  0xe6   :  { %119 = dma.vmem_to_hbm [thread:$0]  %s117_s22, 128, %s285_s3, [#allocation3]  }
  0xe7   :  { %200 = dma.done.wait [#allocation3], 128  }
  0xe8   :  { %201 = vsyncadd [#allocation3], 4294967168 }
  0xe9   :  { %123 = vsyncpa [#allocation3], 1 }

</bundles_post_ra>
